<compile_context>
chip_gen: v6e
topology: v6e:2x2x1
jax: 0.10.0
libtpu: 0.0.40
codegen_flags: <defaults>
</compile_context>

<pallas_src>
import functools

import jax
import jax.numpy as jnp
import numpy as np
from jax.experimental import pallas as pl
from jax.experimental.pallas import tpu as pltpu

_LANES = 128


def _round_up(x, m):
    return (x + m - 1) // m * m


def _focal_loss_kernel(p_ref, y_ref, out_ref, acc_ref, *,
                       gamma, pt_epsilon, n_valid, block_rows, steps_per_part):
    i = pl.program_id(1)          # reduction steps within this partition
    part = pl.program_id(0)       # partition (sharded across cores on v7x)

    @pl.when(i == 0)
    def _():
        acc_ref[...] = jnp.zeros_like(acc_ref)

    p = p_ref[...]
    y = y_ref[...]

    pt = jnp.where(y == 1.0, p, 1.0 - p)
    ce = -jnp.log(pt + pt_epsilon)
    one_minus_pt = 1.0 - pt

    g = float(gamma)
    if g == 0.0:
        fl = ce
    else:
        if g == 1.0:
            w = one_minus_pt
        elif g.is_integer() and 0.0 < g <= 8.0:
            w = one_minus_pt
            for _ in range(int(g) - 1):
                w = w * one_minus_pt
        else:
            w = one_minus_pt ** g          # non-integer gamma fallback (EUP)
        fl = w * ce

    # Mask padded / out-of-bounds tail elements (and the redundant re-read
    # block that can occur on the megacore-split path). VPU-only, free filler
    # under the memory-bound regime; also kills any NaN/Inf from OOB garbage.
    step = part * steps_per_part + i       # un-clamped global block index
    row = jax.lax.broadcasted_iota(jnp.int32, fl.shape, 0)
    lane = jax.lax.broadcasted_iota(jnp.int32, fl.shape, 1)
    flat_idx = (step * block_rows + row) * _LANES + lane
    fl = jnp.where(flat_idx < n_valid, fl, 0.0)

    # Elementwise accumulation every step; expensive reduction only once.
    acc_ref[...] = acc_ref[...] + fl

    @pl.when(i == steps_per_part - 1)
    def _():
        # Reduce (block_rows,128) -> (8,128) partial sums (vreg-wise adds).
        out_ref[...] = acc_ref[...].reshape(block_rows // 8, 8, _LANES).sum(axis=0)


def focal_loss_pallas(p, y, *, gamma=1.0, pt_epsilon=1e-4, reduction="sum",
                      max_block_rows=2048, num_parts=2):
    if reduction != "sum":
        raise Exception("Wrong reduction chosen!")

    # Glue: channel-0 select (one XLA slice) + free flatten.
    # TODO(synk): folding the channel select into the BlockSpec would force
    # tiny per-image tiles; the single slice copy is the cheaper tradeoff.
    p0 = p[:, 0].astype(jnp.float32).reshape(-1)
    y0 = y[:, 0].astype(jnp.float32).reshape(-1)
    n = p0.shape[0]

    # Pad (only if needed) to the (8,128) tiling grain; padded tail is masked
    # in-kernel, so pad values are irrelevant.
    min_tile = 8 * _LANES
    n_pad = _round_up(n, min_tile)
    if n_pad != n:
        p0 = jnp.pad(p0, (0, n_pad - n))
        y0 = jnp.pad(y0, (0, n_pad - n))

    rows = n_pad // _LANES
    block_rows = _round_up(min(max_block_rows, rows), 8)
    total_steps = pl.cdiv(rows, block_rows)
    num_parts = num_parts if total_steps >= num_parts else 1
    steps_per_part = pl.cdiv(total_steps, num_parts)

    p2d = p0.reshape(rows, _LANES)
    y2d = y0.reshape(rows, _LANES)

    def in_map(part, i):
        # Clamp so a fully-out-of-range step just re-reads the last real block
        # (its contribution is zeroed by the in-kernel mask).
        step = jnp.minimum(part * steps_per_part + i, total_steps - 1)
        return (step, 0)

    kernel = functools.partial(
        _focal_loss_kernel,
        gamma=float(gamma),
        pt_epsilon=float(pt_epsilon),
        n_valid=n,
        block_rows=block_rows,
        steps_per_part=steps_per_part,
    )

    partials = pl.pallas_call(
        kernel,
        out_shape=jax.ShapeDtypeStruct((num_parts * 8, _LANES), jnp.float32),
        grid_spec=pltpu.PrefetchScalarGridSpec(
            num_scalar_prefetch=0,
            grid=(num_parts, steps_per_part),
            in_specs=[
                pl.BlockSpec((block_rows, _LANES), in_map),
                pl.BlockSpec((block_rows, _LANES), in_map),
            ],
            out_specs=pl.BlockSpec((8, _LANES), lambda part, i: (part, 0)),
            scratch_shapes=[pltpu.VMEM((block_rows, _LANES), jnp.float32)],
        ),
        compiler_params=pltpu.CompilerParams(
            dimension_semantics=("parallel", "arbitrary"),
        ),
    )(p2d, y2d)

    # Tiny (num_parts*8, 128) partial-sum slab -> scalar.
    return jnp.sum(partials)


def focal_loss_ref(p, y, *, gamma=1.0, pt_epsilon=1e-4):
    p0 = p[:, 0]
    y0 = y[:, 0]
    pt = jnp.where(y0 == 1.0, p0, 1.0 - p0)
    ce = -jnp.log(pt + pt_epsilon)
    fl = (1.0 - pt) ** gamma * ce
    return jnp.sum(fl)


if __name__ == "__main__":
    key = jax.random.PRNGKey(0)
    kp, ky = jax.random.split(key)

    # NCHW inputs, matching the PyTorch module's expectations.
    N, C, H, W = 2, 4, 16, 16
    p = jax.random.uniform(kp, (N, C, H, W), dtype=jnp.float32,
                           minval=0.01, maxval=0.99)
    y = (jax.random.uniform(ky, (N, C, H, W), dtype=jnp.float32) > 0.5).astype(
        jnp.float32)

    out = focal_loss_pallas(p, y, gamma=1.0, pt_epsilon=1e-4, reduction="sum")
    out = jax.block_until_ready(out)

    ref = jax.block_until_ready(focal_loss_ref(p, y, gamma=1.0, pt_epsilon=1e-4))
    np.testing.assert_allclose(np.asarray(out), np.asarray(ref),
                               rtol=1e-5, atol=1e-4)

    print("KERNEL_OK")
</pallas_src>

<mosaic_0001>
module attributes {stable_mosaic.version = 11 : i64} {
  func.func @_focal_loss_kernel(%arg0: i32, %arg1: i32, %arg2: memref<8x128xf32, #tpu.memory_space<vmem>>, %arg3: memref<8x128xf32, #tpu.memory_space<vmem>>, %arg4: memref<8x128xf32, #tpu.memory_space<vmem>>, %arg5: memref<8x128xf32, #tpu.memory_space<vmem>>) attributes {dimension_semantics = [#tpu.dimension_semantics<parallel>, #tpu.dimension_semantics<arbitrary>], iteration_bounds = array<i64: 1, 1>, scalar_prefetch = 0 : i64, scratch_operands = 1 : i64, tpu.core_type = #tpu.core_type<tc>, window_params = [{transform_indices = @transform_0, window_bounds = array<i64: 8, 128>}, {transform_indices = @transform_1, window_bounds = array<i64: 8, 128>}, {transform_indices = @transform_2, window_bounds = array<i64: 8, 128>}]} {
    %c0_i32 = arith.constant 0 : i32
    %0 = arith.cmpi eq, %arg1, %c0_i32 : i32
    %1 = arith.extui %0 : i1 to i32
    %c0_i32_0 = arith.constant 0 : i32
    %2 = arith.cmpi ne, %1, %c0_i32_0 : i32
    scf.if %2 {
      %cst_15 = arith.constant 0.000000e+00 : f32
      %38 = vector.broadcast %cst_15 : f32 to vector<8x128xf32>
      %c0_16 = arith.constant 0 : index
      %c0_17 = arith.constant 0 : index
      %39 = vector.load %arg5[%c0_16, %c0_17] : memref<8x128xf32, #tpu.memory_space<vmem>>, vector<8x128xf32>
      tpu.vector_store %arg5[%c0_16, %c0_17], %38 {strides = array<i32>} : memref<8x128xf32, #tpu.memory_space<vmem>>, vector<8x128xf32>,
    } else {
    }
    %c0 = arith.constant 0 : index
    %c0_1 = arith.constant 0 : index
    %3 = vector.load %arg2[%c0, %c0_1] : memref<8x128xf32, #tpu.memory_space<vmem>>, vector<8x128xf32>
    %c0_2 = arith.constant 0 : index
    %c0_3 = arith.constant 0 : index
    %4 = vector.load %arg3[%c0_2, %c0_3] : memref<8x128xf32, #tpu.memory_space<vmem>>, vector<8x128xf32>
    %cst = arith.constant 1.000000e+00 : f32
    %5 = vector.broadcast %cst : f32 to vector<8x128xf32>
    %6 = arith.cmpf oeq, %4, %5 : vector<8x128xf32>
    %cst_4 = arith.constant 1.000000e+00 : f32
    %7 = vector.broadcast %cst_4 : f32 to vector<8x128xf32>
    %8 = arith.subf %7, %3 : vector<8x128xf32>
    %9 = arith.select %6, %3, %8 : vector<8x128xi1>, vector<8x128xf32>
    %cst_5 = arith.constant 9.99999974E-5 : f32
    %10 = vector.broadcast %cst_5 : f32 to vector<8x128xf32>
    %11 = arith.addf %9, %10 : vector<8x128xf32>
    %12 = math.log %11 : vector<8x128xf32>
    %cst_6 = arith.constant 0.000000e+00 : f32
    %13 = vector.broadcast %cst_6 : f32 to vector<8x128xf32>
    %14 = arith.subf %13, %12 : vector<8x128xf32>
    %cst_7 = arith.constant 1.000000e+00 : f32
    %15 = vector.broadcast %cst_7 : f32 to vector<8x128xf32>
    %16 = arith.subf %15, %9 : vector<8x128xf32>
    %17 = arith.mulf %16, %14 : vector<8x128xf32>
    %c1_i32 = arith.constant 1 : i32
    %18 = arith.muli %arg0, %c1_i32 : i32
    %19 = arith.addi %18, %arg1 : i32
    %20 = tpu.iota {dimensions = array<i32: 0>} : vector<8x128xi32>
    %21 = tpu.iota {dimensions = array<i32: 1>} : vector<8x128xi32>
    %c8_i32 = arith.constant 8 : i32
    %22 = arith.muli %19, %c8_i32 : i32
    %23 = vector.broadcast %22 : i32 to vector<8x128xi32>
    %24 = arith.addi %23, %20 : vector<8x128xi32>
    %c128_i32 = arith.constant 128 : i32
    %25 = vector.broadcast %c128_i32 : i32 to vector<8x128xi32>
    %26 = arith.muli %24, %25 : vector<8x128xi32>
    %27 = arith.addi %26, %21 : vector<8x128xi32>
    %c512_i32 = arith.constant 512 : i32
    %28 = vector.broadcast %c512_i32 : i32 to vector<8x128xi32>
    %29 = arith.cmpi slt, %27, %28 : vector<8x128xi32>
    %cst_8 = arith.constant 0.000000e+00 : f32
    %30 = vector.broadcast %cst_8 : f32 to vector<8x128xf32>
    %31 = arith.select %29, %17, %30 : vector<8x128xi1>, vector<8x128xf32>
    %c0_9 = arith.constant 0 : index
    %c0_10 = arith.constant 0 : index
    %32 = vector.load %arg5[%c0_9, %c0_10] : memref<8x128xf32, #tpu.memory_space<vmem>>, vector<8x128xf32>
    %33 = arith.addf %32, %31 : vector<8x128xf32>
    %c0_11 = arith.constant 0 : index
    %c0_12 = arith.constant 0 : index
    %34 = vector.load %arg5[%c0_11, %c0_12] : memref<8x128xf32, #tpu.memory_space<vmem>>, vector<8x128xf32>
    tpu.vector_store %arg5[%c0_11, %c0_12], %33 {strides = array<i32>} : memref<8x128xf32, #tpu.memory_space<vmem>>, vector<8x128xf32>,
    %c0_i32_13 = arith.constant 0 : i32
    %35 = arith.cmpi eq, %arg1, %c0_i32_13 : i32
    %36 = arith.extui %35 : i1 to i32
    %c0_i32_14 = arith.constant 0 : i32
    %37 = arith.cmpi ne, %36, %c0_i32_14 : i32
    scf.if %37 {
      %c0_15 = arith.constant 0 : index
      %c0_16 = arith.constant 0 : index
      %38 = vector.load %arg5[%c0_15, %c0_16] : memref<8x128xf32, #tpu.memory_space<vmem>>, vector<8x128xf32>
      %39 = vector.shape_cast %38 : vector<8x128xf32> to vector<1x8x128xf32>
      %cst_17 = arith.constant dense<0.000000e+00> : vector<8x128xf32>
      %40 = vector.multi_reduction <add>, %39, %cst_17 [0] : vector<1x8x128xf32> to vector<8x128xf32>
      %c0_18 = arith.constant 0 : index
      %c0_19 = arith.constant 0 : index
      %41 = vector.load %arg4[%c0_18, %c0_19] : memref<8x128xf32, #tpu.memory_space<vmem>>, vector<8x128xf32>
      tpu.vector_store %arg4[%c0_18, %c0_19], %40 {strides = array<i32>} : memref<8x128xf32, #tpu.memory_space<vmem>>, vector<8x128xf32>,
    } else {
    }
    return
  }
  func.func @transform_0(%arg0: i32, %arg1: i32) -> (i32, i32) {
    %c1_i32 = arith.constant 1 : i32
    %0 = arith.muli %arg0, %c1_i32 : i32
    %1 = arith.addi %0, %arg1 : i32
    %c0_i32 = arith.constant 0 : i32
    %2 = arith.minsi %1, %c0_i32 : i32
    %c0_i32_0 = arith.constant 0 : i32
    %c0_i32_1 = arith.constant 0 : i32
    return %2, %c0_i32_0 : i32, i32
  }
  func.func @transform_1(%arg0: i32, %arg1: i32) -> (i32, i32) {
    %c1_i32 = arith.constant 1 : i32
    %0 = arith.muli %arg0, %c1_i32 : i32
    %1 = arith.addi %0, %arg1 : i32
    %c0_i32 = arith.constant 0 : i32
    %2 = arith.minsi %1, %c0_i32 : i32
    %c0_i32_0 = arith.constant 0 : i32
    %c0_i32_1 = arith.constant 0 : i32
    return %2, %c0_i32_0 : i32, i32
  }
  func.func @transform_2(%arg0: i32, %arg1: i32) -> (i32, i32) {
    %c0_i32 = arith.constant 0 : i32
    %c0_i32_0 = arith.constant 0 : i32
    return %arg0, %c0_i32 : i32, i32
  }
}

</mosaic_0001>

<bundles_post_ra>
// kernel: tpu_custom_call.1
= control target key start
LH: loop header
LB: loop body
LE: loop exit
PB: predicated region body
PF: predicated region fallthrough
CT: control target
= control target key end

     0   :  { %7 = vsyncpa [#allocation4], 0  ;;  %s207_s0 = inlined_call_operand.hbm [shape: f32[8,128], index: 0, kind: input, shape index: {}]   ;;  %s208_s1 = inlined_call_operand.hbm [shape: f32[8,128], index: 1, kind: input, shape index: {}]   ;;  %s209_s2 = inlined_call_operand.hbm [shape: f32[8,128], index: 2, kind: output, shape index: {}]  }
   0x1   :  { %8 = vsyncpa [#allocation7], 0 }
   0x2   :  { %9 = vsyncpa [#allocation5], 0  ;;  %s180_s9 = smov [#allocation3]   ;;  %s181_s11 = smov [#allocation6]  }
   0x3   :  { %s21_s10 = sshll.u32 %s180_s9, 4  ;;  %s36_s12 = sshll.u32 %s181_s11, 4  ;;  %s22_s10 = int_to_ptr.vmem [resolvable:$true] %s21_s10  ;;  %s37_s12 = int_to_ptr.vmem [resolvable:$true] %s36_s12 }
   0x4   :  { %s122_s13 = scalar_lea.vmem %s22_s10, 128  ;;  %p127_p1 = scmp.lt.s32.totalorder %s22_s10, %s22_s10 }
   0x5   :  { %p123_p0 = scmp.ne.s32.totalorder %s22_s10, %s122_s13  ;;  %p128_p2 = scmp.lt.s32.totalorder %s122_s13, %s122_s13 }
   0x7   :  { %p129_p3 = por %p128_p2, %p127_p1 }
   0x9   :  { %p130_p4 = pnand %p129_p3, %p123_p0 }
   0xb   :  { %133 = shalt.err (!%p130_p4)
}
   0xc   :  { %24 = dma.hbm_to_vmem [thread:$0]  %s207_s0, 128, %s22_s10, [#allocation4]  }
   0xd   :  { %s142_s16 = scalar_lea.vmem %s37_s12, 128  ;;  %p147_p6 = scmp.lt.s32.totalorder %s37_s12, %s37_s12 }
   0xe   :  { %p143_p5 = scmp.ne.s32.totalorder %s37_s12, %s142_s16  ;;  %p148_p7 = scmp.lt.s32.totalorder %s142_s16, %s142_s16 }
  0x10   :  { %p149_p8 = por %p148_p7, %p147_p6 }
  0x12   :  { %p150_p9 = pnand %p149_p8, %p143_p5 }
  0x14   :  { %153 = shalt.err (!%p150_p9)
}
  0x15   :  { %39 = dma.hbm_to_vmem [thread:$0]  %s208_s1, 128, %s37_s12, [#allocation7]  }
  0x16   :  { %174 = dma.done.wait [#allocation4], 128  }
  0x17   :  { %175 = vsyncadd [#allocation4], 4294967168 }
  0x18   :  { %176 = dma.done.wait [#allocation7], 128  }
  0x19   :  { %177 = vsyncadd [#allocation7], 4294967168  ;;  %v57_v0 = vld [vmem:[#allocation3] sm:$0xff]  ;;  %v58_v1 = vld [vmem:[#allocation6] sm:$0xff]  ;;  %v69_v5 = vlaneseq  ;;  %s182_s0 = smov [#allocation8]  }
  0x1a   :  { %vm59_vm0 = vcmp.eq.f32.partialorder %v58_v1, 1.0  ;;  %v60_v2 = vsub.f32 1.0, %v57_v0  ;;  %s95_s1 = sshll.u32 %s182_s0, 4  ;;  %s96_s1 = int_to_ptr.vmem [resolvable:$true] %s95_s1 }
  0x1b   :  { %v70_v6 = vshrl.u32 %v69_v5, 7  ;;  %v72_v7 = vand.u32 127, %v69_v5  ;;  %s154_s19 = scalar_lea.vmem %s96_s1, 128  ;;  %p159_p11 = scmp.lt.s32.totalorder %s96_s1, %s96_s1 }
  0x1c   :  { %v61_v3 = vsel %vm59_vm0, %v57_v0, %v60_v2  ;;  %p155_p10 = scmp.ne.s32.totalorder %s96_s1, %s154_s19  ;;  %p160_p12 = scmp.lt.s32.totalorder %s154_s19, %s154_s19 }
  0x1d   :  { %v62_v4 = vadd.f32 0.0001, %v61_v3  ;;  %v76_v8 = vmul.u32 128, %v70_v6  ;;  %v66_v12 = vsub.f32 1.0, %v61_v3 }
  0x1e   :  { %p161_p13 = por %p160_p12, %p159_p11 }
  0x1f   :  { %112 = vlog2.f32 %v62_v4  ;;  %v77_v10 = vadd.s32 %v76_v8, %v72_v7 }
  0x20   :  { %p162_p0 = pnand %p161_p13, %p155_p10 }
  0x21   :  { %vm78_vm1 = vcmp.lt.s32.totalorder %v77_v10, 512 }
  0x2c   :  { %v113_v9 = vpop.eup %112 }
  0x2d   :  { %v64_v11 = vmul.f32 0.6931472, %v113_v9 }
  0x2f   :  { %v65_v13 = vsub.f32 0.0, %v64_v11 }
  0x31   :  { %v67_v14 = vmul.f32 %v66_v12, %v65_v13 }
  0x33   :  { %v79_v15 = vsel %vm78_vm1, %v67_v14, 0.0 }
  0x34   :  { %88 = vst [vmem:[#allocation8] sm:$0xff] %v79_v15 }
  0x35   :  { %165 = shalt.err (!%p162_p0)
}
  0x36   :  { %98 = dma.vmem_to_hbm [thread:$0]  %s96_s1, 128, %s209_s2, [#allocation5]  }
  0x37   :  { %178 = dma.done.wait [#allocation5], 128  }
  0x38   :  { %179 = vsyncadd [#allocation5], 4294967168 }
  0x39   :  { %102 = vsyncpa [#allocation4], 1 }
  0x3a   :  { %103 = vsyncpa [#allocation7], 1 }
  0x3b   :  { %104 = vsyncpa [#allocation5], 1 }

</bundles_post_ra>
